<compile_context>
chip_gen: v6e
topology: v6e:2x2x1
jax: 0.10.0
libtpu: 0.0.40
codegen_flags: <defaults>
</compile_context>

<pallas_src>
import jax
import jax.numpy as jnp
from jax.experimental import pallas as pl
from jax.experimental.pallas import tpu as pltpu

HIDDEN = 100       # neuron_numbers_1 == neuron_numbers_2 in the PyTorch module
HIDDEN_PAD = 128   # lane-aligned hidden width
LANE = 128
SUBLANE = 16       # bf16 output tile -> 16-row sublane packing granule


def _round_up(n, m):
    return (n + m - 1) // m * m


def _cdiv(a, b):
    return -(-a // b)


def net_kernel(x_ref, w1_ref, b1_ref, w2_ref, b2_ref, wo_ref, bo_ref, o_ref):
    # x_ref: (tb, F) f32 batch tile -- cast to bf16 in-kernel.
    # w*_ref: pre-transposed [in, out], lane-padded, bf16 (VMEM-resident).
    # b*_ref: (1, out_pad) f32 (added post f32 accumulation).
    x = x_ref[...].astype(jnp.bfloat16)

    # fc1 + relu
    h1 = jnp.dot(x, w1_ref[...], preferred_element_type=jnp.float32) + b1_ref[...]
    h1 = jnp.maximum(h1, 0.0)

    # fc2 + relu
    h2 = jnp.dot(h1.astype(jnp.bfloat16), w2_ref[...],
                 preferred_element_type=jnp.float32) + b2_ref[...]
    h2 = jnp.maximum(h2, 0.0)

    # fc2 applied AGAIN (exactly as in the PyTorch forward; fc3 unused) + relu
    h3 = jnp.dot(h2.astype(jnp.bfloat16), w2_ref[...],
                 preferred_element_type=jnp.float32) + b2_ref[...]
    h3 = jnp.maximum(h3, 0.0)

    # output layer (no activation); bf16 store halves padded-output writeback.
    out = jnp.dot(h3.astype(jnp.bfloat16), wo_ref[...],
                  preferred_element_type=jnp.float32) + bo_ref[...]
    o_ref[...] = out.astype(o_ref.dtype)


def prepare_params(params):
    """One-time parameter prep: transpose to [in, out], zero-pad to lane width,
    cast matmul operands to bf16.  Biases stay f32 (added post-accumulation)."""
    w1, b1, w2, b2, wo, bo = params
    feat = w1.shape[1]
    hid = w1.shape[0]
    rew = wo.shape[0]
    out_pad = _round_up(rew, LANE)

    w1_t = jnp.zeros((feat, HIDDEN_PAD), jnp.float32).at[:, :hid].set(w1.T)
    b1_p = jnp.zeros((1, HIDDEN_PAD), jnp.float32).at[0, :hid].set(b1)
    w2_t = jnp.zeros((HIDDEN_PAD, HIDDEN_PAD), jnp.float32).at[:hid, :hid].set(w2.T)
    b2_p = jnp.zeros((1, HIDDEN_PAD), jnp.float32).at[0, :hid].set(b2)
    wo_t = jnp.zeros((HIDDEN_PAD, out_pad), jnp.float32).at[:hid, :rew].set(wo.T)
    bo_p = jnp.zeros((1, out_pad), jnp.float32).at[0, :rew].set(bo)

    return (w1_t.astype(jnp.bfloat16), b1_p,
            w2_t.astype(jnp.bfloat16), b2_p,
            wo_t.astype(jnp.bfloat16), bo_p)


def _choose_batch_tile(batch, max_block, min_steps):
    """Balanced batch tiles, multiple of SUBLANE rows; pad waste < SUBLANE/step."""
    max_block = max(SUBLANE, (int(max_block) // SUBLANE) * SUBLANE)
    steps = max(int(min_steps), _cdiv(batch, max_block))
    tb = _round_up(_cdiv(batch, steps), SUBLANE)
    b_pad = _round_up(batch, tb)
    return tb, b_pad


def net_forward(x, padded_params, reward_numbers, *, block_b=1024, min_grid_steps=1):
    """x: [B, feature_numbers] float32 -> [B, reward_numbers] float32.

    block_b: max rows per grid step (rounded down to a multiple of 16).
    min_grid_steps: set to 2 on v7x so the 'parallel' batch axis uses both TCs.
    """
    w1_t, b1_p, w2_t, b2_p, wo_t, bo_p = padded_params
    B, F = x.shape
    out_pad = wo_t.shape[1]

    tb, b_pad = _choose_batch_tile(B, block_b, min_grid_steps)
    x_p = x if b_pad == B else jnp.pad(x, ((0, b_pad - B), (0, 0)))

    out = pl.pallas_call(
        net_kernel,
        out_shape=jax.ShapeDtypeStruct((b_pad, out_pad), jnp.bfloat16),
        grid_spec=pltpu.PrefetchScalarGridSpec(
            num_scalar_prefetch=0,
            grid=(b_pad // tb,),
            in_specs=[
                pl.BlockSpec((tb, F), lambda i: (i, 0)),        # x tile streams
                pl.BlockSpec(w1_t.shape, lambda i: (0, 0)),      # params stay
                pl.BlockSpec(b1_p.shape, lambda i: (0, 0)),      #   VMEM-resident
                pl.BlockSpec(w2_t.shape, lambda i: (0, 0)),
                pl.BlockSpec(b2_p.shape, lambda i: (0, 0)),
                pl.BlockSpec(wo_t.shape, lambda i: (0, 0)),
                pl.BlockSpec(bo_p.shape, lambda i: (0, 0)),
            ],
            out_specs=pl.BlockSpec((tb, out_pad), lambda i: (i, 0)),
        ),
        compiler_params=pltpu.CompilerParams(
            dimension_semantics=("parallel",)),
    )(x_p, w1_t, b1_p, w2_t, b2_p, wo_t, bo_p)

    return out[:B, :reward_numbers].astype(jnp.float32)


def init_params(key, feature_numbers, reward_numbers, hidden=HIDDEN):
    """Deterministic synthetic init mirroring the PyTorch shapes (f32)."""
    k1, k2, k3, k4, _, _, k7, k8 = jax.random.split(key, 8)
    w1 = 0.1 * jax.random.normal(k1, (hidden, feature_numbers), jnp.float32)
    b1 = jax.random.uniform(k2, (hidden,), jnp.float32, -0.1, 0.1)
    w2 = 0.1 * jax.random.normal(k3, (hidden, hidden), jnp.float32)
    b2 = jax.random.uniform(k4, (hidden,), jnp.float32, -0.1, 0.1)
    # fc3 exists in __init__ but is never used in forward; omitted on purpose.
    wo = 0.1 * jax.random.normal(k7, (reward_numbers, hidden), jnp.float32)
    bo = jax.random.uniform(k8, (reward_numbers,), jnp.float32, -0.1, 0.1)
    return (w1, b1, w2, b2, wo, bo)


def net_forward_ref(x, params):
    """Plain-JAX f32 reference of the exact PyTorch forward."""
    w1, b1, w2, b2, wo, bo = params
    h1 = jnp.maximum(x @ w1.T + b1, 0.0)
    h2 = jnp.maximum(h1 @ w2.T + b2, 0.0)
    h3 = jnp.maximum(h2 @ w2.T + b2, 0.0)
    return h3 @ wo.T + bo


if __name__ == "__main__":
    feature_numbers = 16
    reward_numbers = 4

    key = jax.random.PRNGKey(0)
    kx, kp = jax.random.split(key)
    params = init_params(kp, feature_numbers, reward_numbers)
    padded_params = prepare_params(params)

    ok = True
    # 256: single big tile; 136: balanced tile (tb=144, <=8 padded rows);
    # 8: tiny batch, sublane padding path.
    for batch in (256, 136, 8):
        x = jax.random.normal(jax.random.fold_in(kx, batch),
                              (batch, feature_numbers), jnp.float32)
        out = jax.block_until_ready(net_forward(x, padded_params, reward_numbers))
        ref = net_forward_ref(x, params)
        ok &= out.shape == (batch, reward_numbers)
        # bf16 operands + bf16 output store (f32 accumulation) -> loosened tol.
        ok &= bool(jnp.allclose(out, ref, atol=3e-2, rtol=2e-2))

    # Multi-step grid (v7x-style: 2 balanced "parallel" steps over the batch).
    x = jax.random.normal(jax.random.fold_in(kx, 1),
                          (256, feature_numbers), jnp.float32)
    out = jax.block_until_ready(
        net_forward(x, padded_params, reward_numbers, min_grid_steps=2))
    ok &= bool(jnp.allclose(out, net_forward_ref(x, params), atol=3e-2, rtol=2e-2))

    assert ok
    print("KERNEL_OK")
</pallas_src>

<mosaic_0001>
module attributes {stable_mosaic.version = 11 : i64} {
  func.func @net_kernel(%arg0: i32, %arg1: memref<256x16xf32, #tpu.memory_space<vmem>>, %arg2: memref<16x128xbf16, #tpu.memory_space<vmem>>, %arg3: memref<1x128xf32, #tpu.memory_space<vmem>>, %arg4: memref<128x128xbf16, #tpu.memory_space<vmem>>, %arg5: memref<1x128xf32, #tpu.memory_space<vmem>>, %arg6: memref<128x128xbf16, #tpu.memory_space<vmem>>, %arg7: memref<1x128xf32, #tpu.memory_space<vmem>>, %arg8: memref<256x128xbf16, #tpu.memory_space<vmem>>) attributes {dimension_semantics = [#tpu.dimension_semantics<parallel>], iteration_bounds = array<i64: 1>, scalar_prefetch = 0 : i64, scratch_operands = 0 : i64, tpu.core_type = #tpu.core_type<tc>, window_params = [{transform_indices = @transform_0, window_bounds = array<i64: 256, 16>}, {pipeline_mode = #tpu.pipeline_mode<synchronous>, transform_indices = @transform_1, window_bounds = array<i64: 16, 128>}, {pipeline_mode = #tpu.pipeline_mode<synchronous>, transform_indices = @transform_2, window_bounds = array<i64: 1, 128>}, {pipeline_mode = #tpu.pipeline_mode<synchronous>, transform_indices = @transform_3, window_bounds = array<i64: 128, 128>}, {pipeline_mode = #tpu.pipeline_mode<synchronous>, transform_indices = @transform_4, window_bounds = array<i64: 1, 128>}, {pipeline_mode = #tpu.pipeline_mode<synchronous>, transform_indices = @transform_5, window_bounds = array<i64: 128, 128>}, {pipeline_mode = #tpu.pipeline_mode<synchronous>, transform_indices = @transform_6, window_bounds = array<i64: 1, 128>}, {transform_indices = @transform_7, window_bounds = array<i64: 256, 128>}]} {
    %c0 = arith.constant 0 : index
    %c0_0 = arith.constant 0 : index
    %0 = vector.load %arg1[%c0, %c0_0] : memref<256x16xf32, #tpu.memory_space<vmem>>, vector<256x16xf32>
    %1 = arith.truncf %0 : vector<256x16xf32> to vector<256x16xbf16>
    %c0_1 = arith.constant 0 : index
    %c0_2 = arith.constant 0 : index
    %2 = vector.load %arg2[%c0_1, %c0_2] : memref<16x128xbf16, #tpu.memory_space<vmem>>, vector<16x128xbf16>
    %cst = arith.constant dense<0.000000e+00> : vector<256x128xf32>
    %3 = tpu.matmul %1, %2, %cst {dimension_numbers = #tpu.dot_dimension_numbers<[1], [0], [0], [1], [0, 0, 1, 1], [], []>} : vector<256x16xbf16>, vector<16x128xbf16>, vector<256x128xf32> -> vector<256x128xf32>
    %c0_3 = arith.constant 0 : index
    %c0_4 = arith.constant 0 : index
    %4 = vector.load %arg3[%c0_3, %c0_4] : memref<1x128xf32, #tpu.memory_space<vmem>>, vector<1x128xf32>
    %5 = vector.broadcast %4 : vector<1x128xf32> to vector<256x128xf32>
    %6 = arith.addf %3, %5 : vector<256x128xf32>
    %cst_5 = arith.constant 0.000000e+00 : f32
    %7 = vector.broadcast %cst_5 : f32 to vector<256x128xf32>
    %8 = arith.maximumf %6, %7 : vector<256x128xf32>
    %9 = arith.truncf %8 : vector<256x128xf32> to vector<256x128xbf16>
    %c0_6 = arith.constant 0 : index
    %c0_7 = arith.constant 0 : index
    %10 = vector.load %arg4[%c0_6, %c0_7] : memref<128x128xbf16, #tpu.memory_space<vmem>>, vector<128x128xbf16>
    %cst_8 = arith.constant dense<0.000000e+00> : vector<256x128xf32>
    %11 = tpu.matmul %9, %10, %cst_8 {dimension_numbers = #tpu.dot_dimension_numbers<[1], [0], [0], [1], [0, 0, 1, 1], [], []>} : vector<256x128xbf16>, vector<128x128xbf16>, vector<256x128xf32> -> vector<256x128xf32>
    %c0_9 = arith.constant 0 : index
    %c0_10 = arith.constant 0 : index
    %12 = vector.load %arg5[%c0_9, %c0_10] : memref<1x128xf32, #tpu.memory_space<vmem>>, vector<1x128xf32>
    %13 = vector.broadcast %12 : vector<1x128xf32> to vector<256x128xf32>
    %14 = arith.addf %11, %13 : vector<256x128xf32>
    %cst_11 = arith.constant 0.000000e+00 : f32
    %15 = vector.broadcast %cst_11 : f32 to vector<256x128xf32>
    %16 = arith.maximumf %14, %15 : vector<256x128xf32>
    %17 = arith.truncf %16 : vector<256x128xf32> to vector<256x128xbf16>
    %c0_12 = arith.constant 0 : index
    %c0_13 = arith.constant 0 : index
    %18 = vector.load %arg4[%c0_12, %c0_13] : memref<128x128xbf16, #tpu.memory_space<vmem>>, vector<128x128xbf16>
    %cst_14 = arith.constant dense<0.000000e+00> : vector<256x128xf32>
    %19 = tpu.matmul %17, %18, %cst_14 {dimension_numbers = #tpu.dot_dimension_numbers<[1], [0], [0], [1], [0, 0, 1, 1], [], []>} : vector<256x128xbf16>, vector<128x128xbf16>, vector<256x128xf32> -> vector<256x128xf32>
    %c0_15 = arith.constant 0 : index
    %c0_16 = arith.constant 0 : index
    %20 = vector.load %arg5[%c0_15, %c0_16] : memref<1x128xf32, #tpu.memory_space<vmem>>, vector<1x128xf32>
    %21 = vector.broadcast %20 : vector<1x128xf32> to vector<256x128xf32>
    %22 = arith.addf %19, %21 : vector<256x128xf32>
    %cst_17 = arith.constant 0.000000e+00 : f32
    %23 = vector.broadcast %cst_17 : f32 to vector<256x128xf32>
    %24 = arith.maximumf %22, %23 : vector<256x128xf32>
    %25 = arith.truncf %24 : vector<256x128xf32> to vector<256x128xbf16>
    %c0_18 = arith.constant 0 : index
    %c0_19 = arith.constant 0 : index
    %26 = vector.load %arg6[%c0_18, %c0_19] : memref<128x128xbf16, #tpu.memory_space<vmem>>, vector<128x128xbf16>
    %cst_20 = arith.constant dense<0.000000e+00> : vector<256x128xf32>
    %27 = tpu.matmul %25, %26, %cst_20 {dimension_numbers = #tpu.dot_dimension_numbers<[1], [0], [0], [1], [0, 0, 1, 1], [], []>} : vector<256x128xbf16>, vector<128x128xbf16>, vector<256x128xf32> -> vector<256x128xf32>
    %c0_21 = arith.constant 0 : index
    %c0_22 = arith.constant 0 : index
    %28 = vector.load %arg7[%c0_21, %c0_22] : memref<1x128xf32, #tpu.memory_space<vmem>>, vector<1x128xf32>
    %29 = vector.broadcast %28 : vector<1x128xf32> to vector<256x128xf32>
    %30 = arith.addf %27, %29 : vector<256x128xf32>
    %31 = arith.truncf %30 : vector<256x128xf32> to vector<256x128xbf16>
    %c0_23 = arith.constant 0 : index
    %c0_24 = arith.constant 0 : index
    %32 = vector.load %arg8[%c0_23, %c0_24] : memref<256x128xbf16, #tpu.memory_space<vmem>>, vector<256x128xbf16>
    tpu.vector_store %arg8[%c0_23, %c0_24], %31 {strides = array<i32>} : memref<256x128xbf16, #tpu.memory_space<vmem>>, vector<256x128xbf16>,
    return
  }
  func.func @transform_0(%arg0: i32) -> (i32, i32) {
    %c0_i32 = arith.constant 0 : i32
    %c0_i32_0 = arith.constant 0 : i32
    return %arg0, %c0_i32 : i32, i32
  }
  func.func @transform_1(%arg0: i32) -> (i32, i32) {
    %c0_i32 = arith.constant 0 : i32
    %c0_i32_0 = arith.constant 0 : i32
    %c0_i32_1 = arith.constant 0 : i32
    return %c0_i32, %c0_i32_0 : i32, i32
  }
  func.func @transform_2(%arg0: i32) -> (i32, i32) {
    %c0_i32 = arith.constant 0 : i32
    %c0_i32_0 = arith.constant 0 : i32
    %c0_i32_1 = arith.constant 0 : i32
    return %c0_i32, %c0_i32_0 : i32, i32
  }
  func.func @transform_3(%arg0: i32) -> (i32, i32) {
    %c0_i32 = arith.constant 0 : i32
    %c0_i32_0 = arith.constant 0 : i32
    %c0_i32_1 = arith.constant 0 : i32
    return %c0_i32, %c0_i32_0 : i32, i32
  }
  func.func @transform_4(%arg0: i32) -> (i32, i32) {
    %c0_i32 = arith.constant 0 : i32
    %c0_i32_0 = arith.constant 0 : i32
    %c0_i32_1 = arith.constant 0 : i32
    return %c0_i32, %c0_i32_0 : i32, i32
  }
  func.func @transform_5(%arg0: i32) -> (i32, i32) {
    %c0_i32 = arith.constant 0 : i32
    %c0_i32_0 = arith.constant 0 : i32
    %c0_i32_1 = arith.constant 0 : i32
    return %c0_i32, %c0_i32_0 : i32, i32
  }
  func.func @transform_6(%arg0: i32) -> (i32, i32) {
    %c0_i32 = arith.constant 0 : i32
    %c0_i32_0 = arith.constant 0 : i32
    %c0_i32_1 = arith.constant 0 : i32
    return %c0_i32, %c0_i32_0 : i32, i32
  }
  func.func @transform_7(%arg0: i32) -> (i32, i32) {
    %c0_i32 = arith.constant 0 : i32
    %c0_i32_0 = arith.constant 0 : i32
    return %arg0, %c0_i32 : i32, i32
  }
}

</mosaic_0001>

<bundles_post_ra>
// kernel: tpu_custom_call.1
= control target key start
LH: loop header
LB: loop body
LE: loop exit
PB: predicated region body
PF: predicated region fallthrough
CT: control target
= control target key end

     0   :  { %vm91_vm0 = vcmask 130048   ;;  %s2136_s0 = inlined_call_operand.vmem [shape: f32[256,16], index: 0, kind: input, shape index: {}]   ;;  %s2137_s1 = inlined_call_operand.vmem [shape: bf16[16,128], index: 1, kind: input, shape index: {}]   ;;  %s2138_s2 = inlined_call_operand.vmem [shape: f32[1,128], index: 2, kind: input, shape index: {}]   ;;  %s2139_s3 = inlined_call_operand.vmem [shape: bf16[128,128], index: 3, kind: input, shape index: {}]   ;;  %s2140_s4 = inlined_call_operand.vmem [shape: f32[1,128], index: 4, kind: input, shape index: {}]   ;;  %s2141_s5 = inlined_call_operand.vmem [shape: bf16[128,128], index: 5, kind: input, shape index: {}]   ;;  %s2142_s6 = inlined_call_operand.vmem [shape: f32[1,128], index: 6, kind: input, shape index: {}]   ;;  %s2143_s7 = inlined_call_operand.hbm [shape: bf16[256,128], index: 7, kind: output, shape index: {}]  }
   0x1   :  { %v1727_v0 = vld [vmem:[%s2137_s1] sm:$0xff]   ;;  %v29_v2 = vld [vmem:[%s2136_s0 + $0x8] sm:$0xff]  ;;  %v30_v3 = vld [vmem:[%s2136_s0 + $0x10] sm:$0xff] }
   0x2   :  { %v28_v1 = vld [vmem:[%s2136_s0] sm:$0xff]  ;;  %1530 = vmatprep.subr.bf16.mxu0 %v1727_v0  ;;  %v31_v5 = vld [vmem:[%s2136_s0 + $0x18] sm:$0xff]  ;;  %v33_v7 = vld [vmem:[%s2136_s0 + $0x28] sm:$0xff] }
   0x3   :  { %v60_v4 = vpack.c.bf16 %v29_v2, %v28_v1  ;;  %v32_v6 = vld [vmem:[%s2136_s0 + $0x20] sm:$0xff]  ;;  %1531 = vmatpush3.bf16.msra.mxu0 %v1727_v0  ;;  %v61_v8 = vpack.c.bf16 %v31_v5, %v30_v3  ;;  %v34_v10 = vld [vmem:[%s2136_s0 + $0x30] sm:$0xff]  ;;  %v35_v11 = vld [vmem:[%s2136_s0 + $0x38] sm:$0xff] }
   0x4   :  { %v62_v9 = vpack.c.bf16 %v33_v7, %v32_v6  ;;  %v36_v12 = vld [vmem:[%s2136_s0 + $0x40] sm:$0xff]  ;;  %v37_v13 = vld [vmem:[%s2136_s0 + $0x48] sm:$0xff]  ;;  %v63_v14 = vpack.c.bf16 %v35_v11, %v34_v10  ;;  %v1728_v16 = vld [vmem:[%s2139_s3 + $0x38] sm:$0xff]  }
   0x5   :  { %1532 = vmatprep.mubr.msk.bf16.mxu0 %vm91_vm0, %v60_v4  ;;  %v64_v15 = vpack.c.bf16 %v37_v13, %v36_v12  ;;  %v38_v17 = vld [vmem:[%s2136_s0 + $0x50] sm:$0xff]  ;;  %v39_v18 = vld [vmem:[%s2136_s0 + $0x58] sm:$0xff]  ;;  %v40_v20 = vld [vmem:[%s2136_s0 + $0x60] sm:$0xff]  ;;  %1564 = vmatprep.subr.bf16.mxu1 %v1728_v16 }
   0x6   :  { %1533 = vmatmul.mubr.msk.bf16.vlgmr.msra.gmra.mxu0 %vm91_vm0, %v61_v8  ;;  %v1729_v19 = vld [vmem:[%s2139_s3 + $0x30] sm:$0xff]   ;;  %v41_v21 = vld [vmem:[%s2136_s0 + $0x68] sm:$0xff]  ;;  %1565 = vmatpush3.bf16.msra.mxu1 %v1728_v16  ;;  %v65_v23 = vpack.c.bf16 %v39_v18, %v38_v17  ;;  %v1731_v24 = vld [vmem:[%s2139_s3 + $0x20] sm:$0xff]  }
   0x7   :  { %1536 = vmatprep.mubr.msk.bf16.mxu0 %vm91_vm0, %v62_v9  ;;  %1566 = vmatprep.subr.bf16.mxu1 %v1729_v19  ;;  %v1730_v22 = vld [vmem:[%s2139_s3 + $0x28] sm:$0xff]   ;;  %v66_v25 = vpack.c.bf16 %v41_v21, %v40_v20  ;;  %v42_v26 = vld [vmem:[%s2136_s0 + $0x70] sm:$0xff]  ;;  %v43_v27 = vld [vmem:[%s2136_s0 + $0x78] sm:$0xff] }
   0x8   :  { %1612 = vmatprep.subr.bf16.mxu0 %v1728_v16  ;;  %v44_v28 = vld [vmem:[%s2136_s0 + $0x80] sm:$0xff]  ;;  %v45_v29 = vld [vmem:[%s2136_s0 + $0x88] sm:$0xff]  ;;  %v1732_v30 = vld [vmem:[%s2139_s3 + $0x18] sm:$0xff]  }
   0x9   :  { %1613 = vmatpush3.bf16.msra.mxu0 %v1728_v16 }
   0xa   :  { %1614 = vmatprep.subr.bf16.mxu0 %v1729_v19  ;;  %1567 = vmatpush3.bf16.msra.mxu1 %v1729_v19 }
   0xb   :  { %1568 = vmatprep.subr.bf16.mxu1 %v1730_v22 }
   0xd   :  { %1615 = vmatpush3.bf16.msra.mxu0 %v1729_v19 }
   0xe   :  { %1537 = vmatmul.mubr.msk.bf16.gmra.mxu0 %vm91_vm0, %v63_v14  ;;  %1616 = vmatprep.subr.bf16.mxu0 %v1730_v22 }
   0xf   :  { %1540 = vmatprep.mubr.msk.bf16.mxu0 %vm91_vm0, %v64_v15  ;;  %1569 = vmatpush3.bf16.msra.mxu1 %v1730_v22 }
  0x10   :  { %1570 = vmatprep.subr.bf16.mxu1 %v1731_v24 }
  0x16   :  { %1541 = vmatmul.mubr.msk.bf16.gmra.mxu0 %vm91_vm0, %v65_v23 }
  0x17   :  { %1544 = vmatprep.mubr.msk.bf16.mxu0 %vm91_vm0, %v66_v25 }
  0x18   :  { %12 = vsyncpa [#allocation3], 0  ;;  %1617 = vmatpush3.bf16.msra.mxu0 %v1730_v22  ;;  %v67_v31 = vpack.c.bf16 %v43_v27, %v42_v26  ;;  %v68_v32 = vpack.c.bf16 %v45_v29, %v44_v28  ;;  %1571 = vmatpush3.bf16.msra.mxu1 %v1731_v24  ;;  %v46_v33 = vld [vmem:[%s2136_s0 + $0x90] sm:$0xff]  ;;  %v47_v34 = vld [vmem:[%s2136_s0 + $0x98] sm:$0xff] }
  0x19   :  { %1618 = vmatprep.subr.bf16.mxu0 %v1731_v24  ;;  %1572 = vmatprep.subr.bf16.mxu1 %v1732_v30  ;;  %v48_v35 = vld [vmem:[%s2136_s0 + $0xa0] sm:$0xff]  ;;  %v49_v36 = vld [vmem:[%s2136_s0 + $0xa8] sm:$0xff]  ;;  %v69_v37 = vpack.c.bf16 %v47_v34, %v46_v33  ;;  %v50_v39 = vld [vmem:[%s2136_s0 + $0xb0] sm:$0xff] }
  0x1a   :  { %v70_v38 = vpack.c.bf16 %v49_v36, %v48_v35  ;;  %v51_v40 = vld [vmem:[%s2136_s0 + $0xb8] sm:$0xff]  ;;  %v52_v41 = vld [vmem:[%s2136_s0 + $0xc0] sm:$0xff]  ;;  %v53_v42 = vld [vmem:[%s2136_s0 + $0xc8] sm:$0xff] }
  0x1b   :  { %v71_v43 = vpack.c.bf16 %v51_v40, %v50_v39  ;;  %v72_v44 = vpack.c.bf16 %v53_v42, %v52_v41  ;;  %v54_v45 = vld [vmem:[%s2136_s0 + $0xd0] sm:$0xff]  ;;  %v55_v46 = vld [vmem:[%s2136_s0 + $0xd8] sm:$0xff]  ;;  %v56_v47 = vld [vmem:[%s2136_s0 + $0xe0] sm:$0xff] }
  0x1c   :  { %1619 = vmatpush3.bf16.msra.mxu0 %v1731_v24  ;;  %1573 = vmatpush3.bf16.msra.mxu1 %v1732_v30  ;;  %v57_v48 = vld [vmem:[%s2136_s0 + $0xe8] sm:$0xff]  ;;  %v73_v49 = vpack.c.bf16 %v55_v46, %v54_v45  ;;  %v58_v51 = vld [vmem:[%s2136_s0 + $0xf0] sm:$0xff]  ;;  %v59_v52 = vld [vmem:[%s2136_s0 + $0xf8] sm:$0xff] }
  0x1d   :  { %1620 = vmatprep.subr.bf16.mxu0 %v1732_v30  ;;  %v74_v50 = vpack.c.bf16 %v57_v48, %v56_v47  ;;  %v75_v53 = vpack.c.bf16 %v59_v52, %v58_v51  ;;  %v1733_v54 = vld [vmem:[%s2139_s3 + $0x10] sm:$0xff]   ;;  %v1734_v55 = vld [vmem:[%s2139_s3 + $0x8] sm:$0xff]   ;;  %v1735_v56 = vld [vmem:[%s2139_s3] sm:$0xff]  }
  0x1e   :  { %1545 = vmatmul.mubr.msk.bf16.gmra.mxu0 %vm91_vm0, %v67_v31  ;;  %1574 = vmatprep.subr.bf16.mxu1 %v1733_v54  ;;  %v1951_v59 = vld [vmem:[%s2138_s2] ss:$0 sm:$0xff] }
  0x1f   :  { %1548 = vmatprep.mubr.msk.bf16.mxu0 %vm91_vm0, %v68_v32 }
  0x20   :  { %1621 = vmatpush3.bf16.msra.mxu0 %v1732_v30  ;;  %1575 = vmatpush3.bf16.msra.mxu1 %v1733_v54 }
  0x21   :  { %1622 = vmatprep.subr.bf16.mxu0 %v1733_v54  ;;  %1576 = vmatprep.subr.bf16.mxu1 %v1734_v55 }
  0x24   :  { %1623 = vmatpush3.bf16.msra.mxu0 %v1733_v54  ;;  %1577 = vmatpush3.bf16.msra.mxu1 %v1734_v55 }
  0x25   :  { %1624 = vmatprep.subr.bf16.mxu0 %v1734_v55  ;;  %1578 = vmatprep.subr.bf16.mxu1 %v1735_v56 }
  0x26   :  { %1549 = vmatmul.mubr.msk.bf16.gmra.mxu0 %vm91_vm0, %v69_v37 }
  0x27   :  { %1552 = vmatprep.mubr.msk.bf16.mxu0 %vm91_vm0, %v70_v38 }
  0x28   :  { %1625 = vmatpush3.bf16.msra.mxu0 %v1734_v55  ;;  %1579 = vmatpush3.bf16.msra.mxu1 %v1735_v56 }
  0x29   :  { %1626 = vmatprep.subr.bf16.mxu0 %v1735_v56 }
  0x2c   :  { %1627 = vmatpush3.bf16.msra.mxu0 %v1735_v56 }
  0x2e   :  { %1553 = vmatmul.mubr.msk.bf16.gmra.mxu0 %vm91_vm0, %v71_v43 }
  0x2f   :  { %1556 = vmatprep.mubr.msk.bf16.mxu0 %vm91_vm0, %v72_v44 }
  0x36   :  { %1557 = vmatmul.mubr.msk.bf16.gmra.mxu0 %vm91_vm0, %v73_v49 }
  0x37   :  { %1560 = vmatprep.mubr.msk.bf16.mxu0 %vm91_vm0, %v74_v50 }
  0x3e   :  { %1561 = vmatmul.mubr.msk.bf16.gmra.mxu0 %vm91_vm0, %v75_v53 }
  0xc6   :  { %v1534_v57 = vpop.f32.mrf.mxu0 }
  0xc7   :  { %v183_v63 = vadd.f32 %v1534_v57, %v1951_v59 }
  0xc8   :  { %v174_v58 = vpop.f32.mrf.mxu0 }
  0xc9   :  { %v175_v61 = vadd.f32 %v1951_v59, %v174_v58  ;;  %v303_v6 = vmax.f32 %v183_v63, 0.0 }
  0xca   :  { %v1535_v60 = vpop.f32.mrf.mxu0 }
  0xcb   :  { %v186_v62 = vadd.f32 %v1535_v60, %v1951_v59  ;;  %v301_v4 = vmax.f32 %v175_v61, 0.0 }
  0xcc   :  { %v177_v0 = vpop.f32.mrf.mxu0 }
  0xcd   :  { %v178_v1 = vadd.f32 %v1951_v59, %v177_v0  ;;  %v304_v2 = vmax.f32 %v186_v62, 0.0 }
  0xce   :  { %v1538_v3 = vpop.f32.mrf.mxu0 }
  0xcf   :  { %v302_v5 = vmax.f32 %v178_v1, 0.0  ;;  %v334_v9 = vpack.c.bf16 %v304_v2, %v303_v6  ;;  %v199_v13 = vadd.f32 %v1538_v3, %v1951_v59 }
  0xd0   :  { %v190_v7 = vpop.f32.mrf.mxu0 }
  0xd1   :  { %v333_v8 = vpack.c.bf16 %v302_v5, %v301_v4  ;;  %v191_v11 = vadd.f32 %v1951_v59, %v190_v7  ;;  %v307_v20 = vmax.f32 %v199_v13, 0.0 }
  0xd2   :  { %v1539_v10 = vpop.f32.mrf.mxu0 }
  0xd3   :  { %v202_v12 = vadd.f32 %v1539_v10, %v1951_v59  ;;  %1580 = vmatprep.mubr.bf16.mxu1 %v333_v8  ;;  %v305_v18 = vmax.f32 %v191_v11, 0.0 }
  0xd4   :  { %v193_v14 = vpop.f32.mrf.mxu0  ;;  %1581 = vmatmul.mubr.bf16.vlgmr.msra.gmra.mxu1 %v334_v9 }
  0xd5   :  { %v194_v15 = vadd.f32 %v1951_v59, %v193_v14  ;;  %v308_v16 = vmax.f32 %v202_v12, 0.0 }
  0xd6   :  { %v1542_v17 = vpop.f32.mrf.mxu0 }
  0xd7   :  { %v306_v19 = vmax.f32 %v194_v15, 0.0  ;;  %v336_v23 = vpack.c.bf16 %v308_v16, %v307_v20  ;;  %v215_v27 = vadd.f32 %v1542_v17, %v1951_v59 }
  0xd8   :  { %v206_v21 = vpop.f32.mrf.mxu0 }
  0xd9   :  { %v335_v22 = vpack.c.bf16 %v306_v19, %v305_v18  ;;  %v207_v25 = vadd.f32 %v1951_v59, %v206_v21  ;;  %v311_v34 = vmax.f32 %v215_v27, 0.0 }
  0xda   :  { %v1543_v24 = vpop.f32.mrf.mxu0 }
  0xdb   :  { %v218_v26 = vadd.f32 %v1543_v24, %v1951_v59  ;;  %1584 = vmatprep.mubr.bf16.mxu1 %v335_v22  ;;  %v309_v32 = vmax.f32 %v207_v25, 0.0 }
  0xdc   :  { %v209_v28 = vpop.f32.mrf.mxu0  ;;  %1585 = vmatmul.mubr.bf16.gmra.mxu1 %v336_v23 }
  0xdd   :  { %v210_v29 = vadd.f32 %v1951_v59, %v209_v28  ;;  %v312_v30 = vmax.f32 %v218_v26, 0.0 }
  0xde   :  { %v1546_v31 = vpop.f32.mrf.mxu0 }
  0xdf   :  { %v310_v33 = vmax.f32 %v210_v29, 0.0  ;;  %v338_v37 = vpack.c.bf16 %v312_v30, %v311_v34  ;;  %v231_v41 = vadd.f32 %v1546_v31, %v1951_v59 }
  0xe0   :  { %v222_v35 = vpop.f32.mrf.mxu0 }
  0xe1   :  { %v337_v36 = vpack.c.bf16 %v310_v33, %v309_v32  ;;  %v223_v39 = vadd.f32 %v1951_v59, %v222_v35  ;;  %v315_v48 = vmax.f32 %v231_v41, 0.0 }
  0xe2   :  { %v1547_v38 = vpop.f32.mrf.mxu0 }
  0xe3   :  { %v234_v40 = vadd.f32 %v1547_v38, %v1951_v59  ;;  %1588 = vmatprep.mubr.bf16.mxu1 %v337_v36  ;;  %v313_v46 = vmax.f32 %v223_v39, 0.0 }
  0xe4   :  { %v225_v42 = vpop.f32.mrf.mxu0  ;;  %1589 = vmatmul.mubr.bf16.gmra.mxu1 %v338_v37 }
  0xe5   :  { %v226_v43 = vadd.f32 %v1951_v59, %v225_v42  ;;  %v316_v44 = vmax.f32 %v234_v40, 0.0 }
  0xe6   :  { %v1550_v45 = vpop.f32.mrf.mxu0 }
  0xe7   :  { %v314_v47 = vmax.f32 %v226_v43, 0.0  ;;  %v340_v51 = vpack.c.bf16 %v316_v44, %v315_v48  ;;  %v247_v55 = vadd.f32 %v1550_v45, %v1951_v59  ;;  %v1736_v43 = vld [vmem:[%s2141_s5 + $0x38] sm:$0xff]   ;;  %v1737_v44 = vld [vmem:[%s2141_s5 + $0x30] sm:$0xff]   ;;  %v1997_v45 = vld [vmem:[%s2141_s5 + $0x20] sm:$0xff]  }
  0xe8   :  { %v238_v49 = vpop.f32.mrf.mxu0  ;;  %1708 = vmatprep.subr.bf16.mxu1 %v1736_v43  ;;  %1660 = vmatprep.subr.bf16.mxu0 %v1736_v43 }
  0xe9   :  { %v339_v50 = vpack.c.bf16 %v314_v47, %v313_v46  ;;  %v239_v53 = vadd.f32 %v1951_v59, %v238_v49  ;;  %v319_v63 = vmax.f32 %v247_v55, 0.0  ;;  %1716 = vmatpush3.bf16.msra.mxu1 %v1736_v43  ;;  %v2003_v46 = vld [vmem:[%s2141_s5 + $0x18] sm:$0xff]   ;;  %v2010_v47 = vld [vmem:[%s2141_s5 + $0x10] sm:$0xff]  }
  0xea   :  { %v1551_v52 = vpop.f32.mrf.mxu0  ;;  %1709 = vmatprep.subr.bf16.mxu1 %v1737_v44 }
  0xeb   :  { %v250_v54 = vadd.f32 %v1551_v52, %v1951_v59  ;;  %1592 = vmatprep.mubr.bf16.mxu1 %v339_v50  ;;  %v317_v61 = vmax.f32 %v239_v53, 0.0  ;;  %v2018_v50 = vld [vmem:[%s2140_s4] ss:$0 sm:$0xff] }
  0xec   :  { %v241_v56 = vpop.f32.mrf.mxu0  ;;  %1593 = vmatmul.mubr.bf16.gmra.mxu1 %v340_v51 }
  0xed   :  { %v242_v57 = vadd.f32 %v1951_v59, %v241_v56  ;;  %v320_v58 = vmax.f32 %v250_v54, 0.0  ;;  %1717 = vmatpush3.bf16.msra.mxu1 %v1737_v44 }
  0xee   :  { %v1554_v60 = vpop.f32.mrf.mxu0 }
  0xef   :  { %v318_v62 = vmax.f32 %v242_v57, 0.0  ;;  %v342_v2 = vpack.c.bf16 %v320_v58, %v319_v63  ;;  %v263_v6 = vadd.f32 %v1554_v60, %v1951_v59 }
  0xf0   :  { %v254_v0 = vpop.f32.mrf.mxu0 }
  0xf1   :  { %v341_v1 = vpack.c.bf16 %v318_v62, %v317_v61  ;;  %v255_v4 = vadd.f32 %v1951_v59, %v254_v0  ;;  %v323_v13 = vmax.f32 %v263_v6, 0.0 }
  0xf2   :  { %v1555_v3 = vpop.f32.mrf.mxu0 }
  0xf3   :  { %v266_v5 = vadd.f32 %v1555_v3, %v1951_v59  ;;  %1596 = vmatprep.mubr.bf16.mxu1 %v341_v1  ;;  %v321_v11 = vmax.f32 %v255_v4, 0.0 }
  0xf4   :  { %v257_v7 = vpop.f32.mrf.mxu0  ;;  %1597 = vmatmul.mubr.bf16.gmra.mxu1 %v342_v2 }
  0xf5   :  { %v258_v8 = vadd.f32 %v1951_v59, %v257_v7  ;;  %v324_v9 = vmax.f32 %v266_v5, 0.0 }
  0xf6   :  { %v1558_v10 = vpop.f32.mrf.mxu0 }
  0xf7   :  { %v322_v12 = vmax.f32 %v258_v8, 0.0  ;;  %v344_v16 = vpack.c.bf16 %v324_v9, %v323_v13  ;;  %v279_v20 = vadd.f32 %v1558_v10, %v1951_v59 }
  0xf8   :  { %v270_v14 = vpop.f32.mrf.mxu0 }
  0xf9   :  { %v343_v15 = vpack.c.bf16 %v322_v12, %v321_v11  ;;  %v271_v18 = vadd.f32 %v1951_v59, %v270_v14  ;;  %v327_v27 = vmax.f32 %v279_v20, 0.0 }
  0xfa   :  { %v1559_v17 = vpop.f32.mrf.mxu0 }
  0xfb   :  { %v282_v19 = vadd.f32 %v1559_v17, %v1951_v59  ;;  %1600 = vmatprep.mubr.bf16.mxu1 %v343_v15  ;;  %v325_v25 = vmax.f32 %v271_v18, 0.0 }
  0xfc   :  { %v273_v21 = vpop.f32.mrf.mxu0  ;;  %1601 = vmatmul.mubr.bf16.gmra.mxu1 %v344_v16 }
  0xfd   :  { %v274_v22 = vadd.f32 %v1951_v59, %v273_v21  ;;  %v328_v23 = vmax.f32 %v282_v19, 0.0 }
  0xfe   :  { %v1562_v24 = vpop.f32.mrf.mxu0 }
  0xff   :  { %v326_v26 = vmax.f32 %v274_v22, 0.0  ;;  %v346_v30 = vpack.c.bf16 %v328_v23, %v327_v27  ;;  %v295_v34 = vadd.f32 %v1562_v24, %v1951_v59 }
 0x100   :  { %v286_v28 = vpop.f32.mrf.mxu0 }
 0x101   :  { %v345_v29 = vpack.c.bf16 %v326_v26, %v325_v25  ;;  %v287_v32 = vadd.f32 %v1951_v59, %v286_v28  ;;  %v331_v40 = vmax.f32 %v295_v34, 0.0 }
 0x102   :  { %v1563_v31 = vpop.f32.mrf.mxu0 }
 0x103   :  { %v298_v33 = vadd.f32 %v1563_v31, %v1951_v59  ;;  %1604 = vmatprep.mubr.bf16.mxu1 %v345_v29  ;;  %v329_v38 = vmax.f32 %v287_v32, 0.0 }
 0x104   :  { %v289_v35 = vpop.f32.mrf.mxu0  ;;  %1605 = vmatmul.mubr.bf16.gmra.mxu1 %v346_v30 }
 0x105   :  { %v290_v36 = vadd.f32 %v1951_v59, %v289_v35  ;;  %v332_v37 = vmax.f32 %v298_v33, 0.0  ;;  %v1738_v59 = vld [vmem:[%s2141_s5 + $0x28] sm:$0xff]  }
 0x106   :  { %1710 = vmatprep.subr.bf16.mxu1 %v1738_v59 }
 0x107   :  { %v330_v39 = vmax.f32 %v290_v36, 0.0  ;;  %v348_v42 = vpack.c.bf16 %v332_v37, %v331_v40  ;;  %1718 = vmatpush3.bf16.msra.mxu1 %v1738_v59 }
 0x108   :  { %1711 = vmatprep.subr.bf16.mxu1 %v1997_v45 }
 0x109   :  { %v347_v41 = vpack.c.bf16 %v330_v39, %v329_v38 }
 0x10b   :  { %1608 = vmatprep.mubr.bf16.mxu1 %v347_v41  ;;  %1719 = vmatpush3.bf16.msra.mxu1 %v1997_v45 }
 0x10c   :  { %1609 = vmatmul.mubr.bf16.gmra.mxu1 %v348_v42  ;;  %1712 = vmatprep.subr.bf16.mxu1 %v2003_v46 }
 0x10f   :  { %1720 = vmatpush3.bf16.msra.mxu1 %v2003_v46 }
 0x110   :  { %1713 = vmatprep.subr.bf16.mxu1 %v2010_v47 }
 0x113   :  { %1721 = vmatpush3.bf16.msra.mxu1 %v2010_v47 }
 0x194   :  { %v1582_v48 = vpop.f32.mrf.mxu1 }
 0x195   :  { %v463_v54 = vadd.f32 %v1582_v48, %v2018_v50 }
 0x196   :  { %v454_v49 = vpop.f32.mrf.mxu1 }
 0x197   :  { %v455_v52 = vadd.f32 %v2018_v50, %v454_v49  ;;  %v583_v62 = vmax.f32 %v463_v54, 0.0 }
 0x198   :  { %v1583_v51 = vpop.f32.mrf.mxu1 }
 0x199   :  { %v466_v53 = vadd.f32 %v1583_v51, %v2018_v50  ;;  %v581_v60 = vmax.f32 %v455_v52, 0.0 }
 0x19a   :  { %v457_v55 = vpop.f32.mrf.mxu1 }
 0x19b   :  { %v458_v56 = vadd.f32 %v2018_v50, %v457_v55  ;;  %v584_v57 = vmax.f32 %v466_v53, 0.0 }
 0x19c   :  { %v1586_v58 = vpop.f32.mrf.mxu1 }
 0x19d   :  { %v582_v61 = vmax.f32 %v458_v56, 0.0  ;;  %v614_v1 = vpack.c.bf16 %v584_v57, %v583_v62  ;;  %v479_v5 = vadd.f32 %v1586_v58, %v2018_v50 }
 0x19e   :  { %v470_v63 = vpop.f32.mrf.mxu1 }
 0x19f   :  { %v613_v0 = vpack.c.bf16 %v582_v61, %v581_v60  ;;  %v471_v3 = vadd.f32 %v2018_v50, %v470_v63  ;;  %v587_v12 = vmax.f32 %v479_v5, 0.0 }
 0x1a0   :  { %v1587_v2 = vpop.f32.mrf.mxu1 }
 0x1a1   :  { %v482_v4 = vadd.f32 %v1587_v2, %v2018_v50  ;;  %1628 = vmatprep.mubr.bf16.mxu0 %v613_v0  ;;  %v585_v10 = vmax.f32 %v471_v3, 0.0 }
 0x1a2   :  { %v473_v6 = vpop.f32.mrf.mxu1  ;;  %1629 = vmatmul.mubr.bf16.vlgmr.msra.gmra.mxu0 %v614_v1 }
 0x1a3   :  { %v474_v7 = vadd.f32 %v2018_v50, %v473_v6  ;;  %1661 = vmatpush3.bf16.msra.mxu0 %v1736_v43  ;;  %v588_v8 = vmax.f32 %v482_v4, 0.0 }
 0x1a4   :  { %v1590_v9 = vpop.f32.mrf.mxu1  ;;  %1662 = vmatprep.subr.bf16.mxu0 %v1737_v44 }
 0x1a5   :  { %v586_v11 = vmax.f32 %v474_v7, 0.0  ;;  %v616_v15 = vpack.c.bf16 %v588_v8, %v587_v12  ;;  %v495_v19 = vadd.f32 %v1590_v9, %v2018_v50 }
 0x1a6   :  { %v486_v13 = vpop.f32.mrf.mxu1 }
 0x1a7   :  { %v615_v14 = vpack.c.bf16 %v586_v11, %v585_v10  ;;  %1663 = vmatpush3.bf16.msra.mxu0 %v1737_v44  ;;  %v487_v17 = vadd.f32 %v2018_v50, %v486_v13  ;;  %v591_v26 = vmax.f32 %v495_v19, 0.0 }
 0x1a8   :  { %v1591_v16 = vpop.f32.mrf.mxu1  ;;  %1664 = vmatprep.subr.bf16.mxu0 %v1738_v59 }
 0x1a9   :  { %v498_v18 = vadd.f32 %v1591_v16, %v2018_v50  ;;  %1632 = vmatprep.mubr.bf16.mxu0 %v615_v14  ;;  %v589_v24 = vmax.f32 %v487_v17, 0.0 }
 0x1aa   :  { %v489_v20 = vpop.f32.mrf.mxu1  ;;  %1633 = vmatmul.mubr.bf16.gmra.mxu0 %v616_v15 }
 0x1ab   :  { %v490_v21 = vadd.f32 %v2018_v50, %v489_v20  ;;  %1665 = vmatpush3.bf16.msra.mxu0 %v1738_v59  ;;  %v592_v22 = vmax.f32 %v498_v18, 0.0 }
 0x1ac   :  { %v1594_v23 = vpop.f32.mrf.mxu1  ;;  %1666 = vmatprep.subr.bf16.mxu0 %v1997_v45 }
 0x1ad   :  { %v590_v25 = vmax.f32 %v490_v21, 0.0  ;;  %v618_v29 = vpack.c.bf16 %v592_v22, %v591_v26  ;;  %v511_v33 = vadd.f32 %v1594_v23, %v2018_v50 }
 0x1ae   :  { %v502_v27 = vpop.f32.mrf.mxu1 }
 0x1af   :  { %v617_v28 = vpack.c.bf16 %v590_v25, %v589_v24  ;;  %1667 = vmatpush3.bf16.msra.mxu0 %v1997_v45  ;;  %v503_v31 = vadd.f32 %v2018_v50, %v502_v27  ;;  %v595_v40 = vmax.f32 %v511_v33, 0.0 }
 0x1b0   :  { %v1595_v30 = vpop.f32.mrf.mxu1  ;;  %1668 = vmatprep.subr.bf16.mxu0 %v2003_v46 }
 0x1b1   :  { %v514_v32 = vadd.f32 %v1595_v30, %v2018_v50  ;;  %1636 = vmatprep.mubr.bf16.mxu0 %v617_v28  ;;  %v593_v38 = vmax.f32 %v503_v31, 0.0 }
 0x1b2   :  { %v505_v34 = vpop.f32.mrf.mxu1  ;;  %1637 = vmatmul.mubr.bf16.gmra.mxu0 %v618_v29 }
 0x1b3   :  { %v506_v35 = vadd.f32 %v2018_v50, %v505_v34  ;;  %1669 = vmatpush3.bf16.msra.mxu0 %v2003_v46  ;;  %v596_v36 = vmax.f32 %v514_v32, 0.0 }
 0x1b4   :  { %v1598_v37 = vpop.f32.mrf.mxu1  ;;  %1670 = vmatprep.subr.bf16.mxu0 %v2010_v47 }
 0x1b5   :  { %v594_v39 = vmax.f32 %v506_v35, 0.0  ;;  %v620_v43 = vpack.c.bf16 %v596_v36, %v595_v40  ;;  %v527_v46 = vadd.f32 %v1598_v37, %v2018_v50  ;;  %v1742_v35 = vld [vmem:[%s2141_s5 + $0x8] sm:$0xff]   ;;  %v1743_v36 = vld [vmem:[%s2141_s5] sm:$0xff]  }
 0x1b6   :  { %v518_v41 = vpop.f32.mrf.mxu1  ;;  %1714 = vmatprep.subr.bf16.mxu1 %v1742_v35 }
 0x1b7   :  { %v619_v42 = vpack.c.bf16 %v594_v39, %v593_v38  ;;  %1671 = vmatpush3.bf16.msra.mxu0 %v2010_v47  ;;  %v519_v59 = vadd.f32 %v2018_v50, %v518_v41  ;;  %v599_v55 = vmax.f32 %v527_v46, 0.0  ;;  %1722 = vmatpush3.bf16.msra.mxu1 %v1742_v35 }
 0x1b8   :  { %v1599_v44 = vpop.f32.mrf.mxu1  ;;  %1672 = vmatprep.subr.bf16.mxu0 %v1742_v35  ;;  %1715 = vmatprep.subr.bf16.mxu1 %v1743_v36 }
 0x1b9   :  { %v530_v45 = vadd.f32 %v1599_v44, %v2018_v50  ;;  %1640 = vmatprep.mubr.bf16.mxu0 %v619_v42  ;;  %v597_v53 = vmax.f32 %v519_v59, 0.0 }
 0x1ba   :  { %v521_v48 = vpop.f32.mrf.mxu1  ;;  %1641 = vmatmul.mubr.bf16.gmra.mxu0 %v620_v43 }
 0x1bb   :  { %v522_v49 = vadd.f32 %v2018_v50, %v521_v48  ;;  %v600_v51 = vmax.f32 %v530_v45, 0.0  ;;  %1673 = vmatpush3.bf16.msra.mxu0 %v1742_v35  ;;  %1723 = vmatpush3.bf16.msra.mxu1 %v1743_v36 }
 0x1bc   :  { %v1602_v52 = vpop.f32.mrf.mxu1  ;;  %1674 = vmatprep.subr.bf16.mxu0 %v1743_v36 }
 0x1bd   :  { %v598_v54 = vmax.f32 %v522_v49, 0.0  ;;  %v622_v57 = vpack.c.bf16 %v600_v51, %v599_v55  ;;  %v543_v62 = vadd.f32 %v1602_v52, %v2018_v50 }
 0x1be   :  { %v534_v56 = vpop.f32.mrf.mxu1 }
 0x1bf   :  { %v621_v47 = vpack.c.bf16 %v598_v54, %v597_v53  ;;  %v535_v60 = vadd.f32 %v2018_v50, %v534_v56  ;;  %v603_v5 = vmax.f32 %v543_v62, 0.0  ;;  %1675 = vmatpush3.bf16.msra.mxu0 %v1743_v36 }
 0x1c0   :  { %v1603_v58 = vpop.f32.mrf.mxu1 }
 0x1c1   :  { %v546_v61 = vadd.f32 %v1603_v58, %v2018_v50  ;;  %1644 = vmatprep.mubr.bf16.mxu0 %v621_v47  ;;  %v601_v3 = vmax.f32 %v535_v60, 0.0 }
 0x1c2   :  { %v537_v63 = vpop.f32.mrf.mxu1  ;;  %1645 = vmatmul.mubr.bf16.gmra.mxu0 %v622_v57 }
 0x1c3   :  { %v538_v0 = vadd.f32 %v2018_v50, %v537_v63  ;;  %v604_v1 = vmax.f32 %v546_v61, 0.0 }
 0x1c4   :  { %v1606_v2 = vpop.f32.mrf.mxu1 }
 0x1c5   :  { %v602_v4 = vmax.f32 %v538_v0, 0.0  ;;  %v624_v8 = vpack.c.bf16 %v604_v1, %v603_v5  ;;  %v559_v12 = vadd.f32 %v1606_v2, %v2018_v50 }
 0x1c6   :  { %v550_v6 = vpop.f32.mrf.mxu1 }
 0x1c7   :  { %v623_v7 = vpack.c.bf16 %v602_v4, %v601_v3  ;;  %v551_v10 = vadd.f32 %v2018_v50, %v550_v6  ;;  %v607_v19 = vmax.f32 %v559_v12, 0.0 }
 0x1c8   :  { %v1607_v9 = vpop.f32.mrf.mxu1 }
 0x1c9   :  { %v562_v11 = vadd.f32 %v1607_v9, %v2018_v50  ;;  %1648 = vmatprep.mubr.bf16.mxu0 %v623_v7  ;;  %v605_v17 = vmax.f32 %v551_v10, 0.0 }
 0x1ca   :  { %v553_v13 = vpop.f32.mrf.mxu1  ;;  %1649 = vmatmul.mubr.bf16.gmra.mxu0 %v624_v8 }
 0x1cb   :  { %v554_v14 = vadd.f32 %v2018_v50, %v553_v13  ;;  %v608_v15 = vmax.f32 %v562_v11, 0.0 }
 0x1cc   :  { %v1610_v16 = vpop.f32.mrf.mxu1 }
 0x1cd   :  { %v606_v18 = vmax.f32 %v554_v14, 0.0  ;;  %v626_v22 = vpack.c.bf16 %v608_v15, %v607_v19  ;;  %v575_v26 = vadd.f32 %v1610_v16, %v2018_v50 }
 0x1ce   :  { %v566_v20 = vpop.f32.mrf.mxu1 }
 0x1cf   :  { %v625_v21 = vpack.c.bf16 %v606_v18, %v605_v17  ;;  %v567_v24 = vadd.f32 %v2018_v50, %v566_v20  ;;  %v611_v32 = vmax.f32 %v575_v26, 0.0 }
 0x1d0   :  { %v1611_v23 = vpop.f32.mrf.mxu1 }
 0x1d1   :  { %v578_v25 = vadd.f32 %v1611_v23, %v2018_v50  ;;  %1652 = vmatprep.mubr.bf16.mxu0 %v625_v21  ;;  %v609_v30 = vmax.f32 %v567_v24, 0.0 }
 0x1d2   :  { %v569_v27 = vpop.f32.mrf.mxu1  ;;  %1653 = vmatmul.mubr.bf16.gmra.mxu0 %v626_v22 }
 0x1d3   :  { %v570_v28 = vadd.f32 %v2018_v50, %v569_v27  ;;  %v612_v29 = vmax.f32 %v578_v25, 0.0 }
 0x1d5   :  { %v610_v31 = vmax.f32 %v570_v28, 0.0  ;;  %v628_v34 = vpack.c.bf16 %v612_v29, %v611_v32 }
 0x1d7   :  { %v627_v33 = vpack.c.bf16 %v610_v31, %v609_v30 }
 0x1d9   :  { %1656 = vmatprep.mubr.bf16.mxu0 %v627_v33 }
 0x1da   :  { %1657 = vmatmul.mubr.bf16.gmra.mxu0 %v628_v34 }
 0x262   :  { %v1630_v37 = vpop.f32.mrf.mxu0 }
 0x263   :  { %v672_v42 = vadd.f32 %v1630_v37, %v2018_v50 }
 0x264   :  { %v663_v38 = vpop.f32.mrf.mxu0 }
 0x265   :  { %v664_v40 = vadd.f32 %v2018_v50, %v663_v38  ;;  %v792_v49 = vmax.f32 %v672_v42, 0.0 }
 0x266   :  { %v1631_v39 = vpop.f32.mrf.mxu0 }
 0x267   :  { %v675_v41 = vadd.f32 %v1631_v39, %v2018_v50  ;;  %v790_v46 = vmax.f32 %v664_v40, 0.0 }
 0x268   :  { %v666_v43 = vpop.f32.mrf.mxu0 }
 0x269   :  { %v667_v44 = vadd.f32 %v2018_v50, %v666_v43  ;;  %v793_v59 = vmax.f32 %v675_v41, 0.0 }
 0x26a   :  { %v1634_v45 = vpop.f32.mrf.mxu0 }
 0x26b   :  { %v791_v48 = vmax.f32 %v667_v44, 0.0  ;;  %v823_v53 = vpack.c.bf16 %v793_v59, %v792_v49  ;;  %v688_v47 = vadd.f32 %v1634_v45, %v2018_v50 }
 0x26c   :  { %v679_v51 = vpop.f32.mrf.mxu0 }
 0x26d   :  { %v822_v52 = vpack.c.bf16 %v791_v48, %v790_v46  ;;  %v680_v55 = vadd.f32 %v2018_v50, %v679_v51  ;;  %v796_v0 = vmax.f32 %v688_v47, 0.0 }
 0x26e   :  { %v1635_v54 = vpop.f32.mrf.mxu0 }
 0x26f   :  { %v691_v56 = vadd.f32 %v1635_v54, %v2018_v50  ;;  %1676 = vmatprep.mubr.bf16.mxu0 %v822_v52  ;;  %v794_v62 = vmax.f32 %v680_v55, 0.0 }
 0x270   :  { %v682_v57 = vpop.f32.mrf.mxu0  ;;  %1677 = vmatmul.mubr.bf16.vlgmr.msra.gmra.mxu0 %v823_v53 }
 0x271   :  { %v683_v58 = vadd.f32 %v2018_v50, %v682_v57  ;;  %v797_v60 = vmax.f32 %v691_v56, 0.0 }
 0x272   :  { %v1638_v61 = vpop.f32.mrf.mxu0 }
 0x273   :  { %v795_v63 = vmax.f32 %v683_v58, 0.0  ;;  %v825_v3 = vpack.c.bf16 %v797_v60, %v796_v0  ;;  %v704_v7 = vadd.f32 %v1638_v61, %v2018_v50 }
 0x274   :  { %v695_v1 = vpop.f32.mrf.mxu0 }
 0x275   :  { %v824_v2 = vpack.c.bf16 %v795_v63, %v794_v62  ;;  %v696_v5 = vadd.f32 %v2018_v50, %v695_v1  ;;  %v800_v14 = vmax.f32 %v704_v7, 0.0 }
 0x276   :  { %v1639_v4 = vpop.f32.mrf.mxu0 }
 0x277   :  { %v707_v6 = vadd.f32 %v1639_v4, %v2018_v50  ;;  %1680 = vmatprep.mubr.bf16.mxu1 %v824_v2  ;;  %v798_v12 = vmax.f32 %v696_v5, 0.0 }
 0x278   :  { %v698_v8 = vpop.f32.mrf.mxu0  ;;  %1681 = vmatmul.mubr.bf16.vlgmr.msra.gmra.mxu1 %v825_v3 }
 0x279   :  { %v699_v9 = vadd.f32 %v2018_v50, %v698_v8  ;;  %v801_v10 = vmax.f32 %v707_v6, 0.0 }
 0x27a   :  { %v1642_v11 = vpop.f32.mrf.mxu0 }
 0x27b   :  { %v799_v13 = vmax.f32 %v699_v9, 0.0  ;;  %v827_v17 = vpack.c.bf16 %v801_v10, %v800_v14  ;;  %v720_v21 = vadd.f32 %v1642_v11, %v2018_v50 }
 0x27c   :  { %v711_v15 = vpop.f32.mrf.mxu0 }
 0x27d   :  { %v826_v16 = vpack.c.bf16 %v799_v13, %v798_v12  ;;  %v712_v19 = vadd.f32 %v2018_v50, %v711_v15  ;;  %v804_v28 = vmax.f32 %v720_v21, 0.0 }
 0x27e   :  { %v1643_v18 = vpop.f32.mrf.mxu0 }
 0x27f   :  { %v723_v20 = vadd.f32 %v1643_v18, %v2018_v50  ;;  %1684 = vmatprep.mubr.bf16.mxu1 %v826_v16  ;;  %v802_v26 = vmax.f32 %v712_v19, 0.0 }
 0x280   :  { %v714_v22 = vpop.f32.mrf.mxu0  ;;  %1685 = vmatmul.mubr.bf16.gmra.mxu1 %v827_v17 }
 0x281   :  { %v715_v23 = vadd.f32 %v2018_v50, %v714_v22  ;;  %v805_v24 = vmax.f32 %v723_v20, 0.0 }
 0x282   :  { %v1646_v25 = vpop.f32.mrf.mxu0 }
 0x283   :  { %v803_v27 = vmax.f32 %v715_v23, 0.0  ;;  %v829_v31 = vpack.c.bf16 %v805_v24, %v804_v28  ;;  %v736_v35 = vadd.f32 %v1646_v25, %v2018_v50  ;;  %v2099_v24 = vld [vmem:[%s2142_s6] ss:$0 sm:$0xff]  ;;  %s1766_s6 = smov [#allocation2]  }
 0x284   :  { %v727_v29 = vpop.f32.mrf.mxu0  ;;  %s1235_s27 = sshll.u32 %s1766_s6, 4  ;;  %s1236_s27 = int_to_ptr.vmem [resolvable:$true] %s1235_s27 }
 0x285   :  { %v828_v30 = vpack.c.bf16 %v803_v27, %v802_v26  ;;  %v728_v33 = vadd.f32 %v2018_v50, %v727_v29  ;;  %v808_v42 = vmax.f32 %v736_v35, 0.0  ;;  %s1744_s28 = scalar_lea.vmem %s1236_s27, 2048  ;;  %p1749_p1 = scmp.lt.s32.totalorder %s1236_s27, %s1236_s27 }
 0x286   :  { %v1647_v32 = vpop.f32.mrf.mxu0  ;;  %p1745_p0 = scmp.ne.s32.totalorder %s1236_s27, %s1744_s28  ;;  %p1750_p2 = scmp.lt.s32.totalorder %s1744_s28, %s1744_s28 }
 0x287   :  { %v739_v34 = vadd.f32 %v1647_v32, %v2018_v50  ;;  %1688 = vmatprep.mubr.bf16.mxu1 %v828_v30  ;;  %v806_v40 = vmax.f32 %v728_v33, 0.0 }
 0x288   :  { %v730_v36 = vpop.f32.mrf.mxu0  ;;  %1689 = vmatmul.mubr.bf16.gmra.mxu1 %v829_v31  ;;  %p1751_p3 = por %p1750_p2, %p1749_p1 }
 0x289   :  { %v731_v37 = vadd.f32 %v2018_v50, %v730_v36  ;;  %v809_v38 = vmax.f32 %v739_v34, 0.0 }
 0x28a   :  { %v1650_v39 = vpop.f32.mrf.mxu0  ;;  %p1752_p4 = pnand %p1751_p3, %p1745_p0 }
 0x28b   :  { %v807_v41 = vmax.f32 %v731_v37, 0.0  ;;  %v831_v59 = vpack.c.bf16 %v809_v38, %v808_v42  ;;  %v752_v49 = vadd.f32 %v1650_v39, %v2018_v50 }
 0x28c   :  { %v743_v43 = vpop.f32.mrf.mxu0 }
 0x28d   :  { %v830_v44 = vpack.c.bf16 %v807_v41, %v806_v40  ;;  %v744_v46 = vadd.f32 %v2018_v50, %v743_v43  ;;  %v812_v47 = vmax.f32 %v752_v49, 0.0 }
 0x28e   :  { %v1651_v45 = vpop.f32.mrf.mxu0 }
 0x28f   :  { %v755_v48 = vadd.f32 %v1651_v45, %v2018_v50  ;;  %1692 = vmatprep.mubr.bf16.mxu1 %v830_v44  ;;  %v810_v55 = vmax.f32 %v744_v46, 0.0 }
 0x290   :  { %v746_v51 = vpop.f32.mrf.mxu0  ;;  %1693 = vmatmul.mubr.bf16.gmra.mxu1 %v831_v59 }
 0x291   :  { %v747_v52 = vadd.f32 %v2018_v50, %v746_v51  ;;  %v813_v53 = vmax.f32 %v755_v48, 0.0 }
 0x292   :  { %v1654_v54 = vpop.f32.mrf.mxu0 }
 0x293   :  { %v811_v56 = vmax.f32 %v747_v52, 0.0  ;;  %v833_v60 = vpack.c.bf16 %v813_v53, %v812_v47  ;;  %v768_v0 = vadd.f32 %v1654_v54, %v2018_v50 }
 0x294   :  { %v759_v57 = vpop.f32.mrf.mxu0 }
 0x295   :  { %v832_v58 = vpack.c.bf16 %v811_v56, %v810_v55  ;;  %v760_v62 = vadd.f32 %v2018_v50, %v759_v57  ;;  %v816_v7 = vmax.f32 %v768_v0, 0.0 }
 0x296   :  { %v1655_v61 = vpop.f32.mrf.mxu0 }
 0x297   :  { %v771_v63 = vadd.f32 %v1655_v61, %v2018_v50  ;;  %1696 = vmatprep.mubr.bf16.mxu1 %v832_v58  ;;  %v814_v5 = vmax.f32 %v760_v62, 0.0 }
 0x298   :  { %v762_v1 = vpop.f32.mrf.mxu0  ;;  %1697 = vmatmul.mubr.bf16.gmra.mxu1 %v833_v60 }
 0x299   :  { %v763_v2 = vadd.f32 %v2018_v50, %v762_v1  ;;  %v817_v3 = vmax.f32 %v771_v63, 0.0 }
 0x29a   :  { %v1658_v4 = vpop.f32.mrf.mxu0 }
 0x29b   :  { %v815_v6 = vmax.f32 %v763_v2, 0.0  ;;  %v835_v10 = vpack.c.bf16 %v817_v3, %v816_v7  ;;  %v784_v14 = vadd.f32 %v1658_v4, %v2018_v50 }
 0x29c   :  { %v775_v8 = vpop.f32.mrf.mxu0 }
 0x29d   :  { %v834_v9 = vpack.c.bf16 %v815_v6, %v814_v5  ;;  %v776_v12 = vadd.f32 %v2018_v50, %v775_v8  ;;  %v820_v20 = vmax.f32 %v784_v14, 0.0 }
 0x29e   :  { %v1659_v11 = vpop.f32.mrf.mxu0 }
 0x29f   :  { %v787_v13 = vadd.f32 %v1659_v11, %v2018_v50  ;;  %1700 = vmatprep.mubr.bf16.mxu1 %v834_v9  ;;  %v818_v18 = vmax.f32 %v776_v12, 0.0 }
 0x2a0   :  { %v778_v15 = vpop.f32.mrf.mxu0  ;;  %1701 = vmatmul.mubr.bf16.gmra.mxu1 %v835_v10 }
 0x2a1   :  { %v779_v16 = vadd.f32 %v2018_v50, %v778_v15  ;;  %v821_v17 = vmax.f32 %v787_v13, 0.0 }
 0x2a3   :  { %v819_v19 = vmax.f32 %v779_v16, 0.0  ;;  %v837_v22 = vpack.c.bf16 %v821_v17, %v820_v20 }
 0x2a5   :  { %v836_v21 = vpack.c.bf16 %v819_v19, %v818_v18 }
 0x2a7   :  { %1704 = vmatprep.mubr.bf16.mxu1 %v836_v21 }
 0x2a8   :  { %1705 = vmatmul.mubr.bf16.gmra.mxu1 %v837_v22 }
 0x330   :  { %v1678_v23 = vpop.f32.mrf.mxu0 }
 0x331   :  { %v952_v27 = vadd.f32 %v1678_v23, %v2099_v24 }
 0x332   :  { %v943_v25 = vpop.f32.mrf.mxu0 }
 0x333   :  { %v944_v29 = vadd.f32 %v2099_v24, %v943_v25 }
 0x334   :  { %v1679_v26 = vpop.f32.mrf.mxu0 }
 0x335   :  { %v955_v50 = vadd.f32 %v1679_v26, %v2099_v24 }
 0x336   :  { %v946_v28 = vpop.f32.mrf.mxu0 }
 0x337   :  { %v1354_v30 = vpack.c.bf16 %v955_v50, %v952_v27  ;;  %v947_v31 = vadd.f32 %v2099_v24, %v946_v28 }
 0x338   :  { %v1682_v32 = vpop.f32.mrf.mxu1 }
 0x339   :  { %1426 = vst [vmem:[#allocation2 + $0x8] sm:$0xff] %v1354_v30   ;;  %v1349_v33 = vpack.c.bf16 %v947_v31, %v944_v29  ;;  %v968_v36 = vadd.f32 %v1682_v32, %v2099_v24 }
 0x33a   :  { %v959_v34 = vpop.f32.mrf.mxu1 }
 0x33b   :  { %1350 = vst [vmem:[#allocation2] sm:$0xff] %v1349_v33   ;;  %v960_v39 = vadd.f32 %v2099_v24, %v959_v34 }
 0x33c   :  { %v1683_v35 = vpop.f32.mrf.mxu1 }
 0x33d   :  { %v971_v37 = vadd.f32 %v1683_v35, %v2099_v24 }
 0x33e   :  { %v962_v38 = vpop.f32.mrf.mxu1 }
 0x33f   :  { %v1364_v40 = vpack.c.bf16 %v971_v37, %v968_v36  ;;  %v963_v41 = vadd.f32 %v2099_v24, %v962_v38 }
 0x340   :  { %v1686_v42 = vpop.f32.mrf.mxu1 }
 0x341   :  { %1428 = vst [vmem:[#allocation2 + $0x18] sm:$0xff] %v1364_v40   ;;  %v1359_v43 = vpack.c.bf16 %v963_v41, %v960_v39  ;;  %v984_v45 = vadd.f32 %v1686_v42, %v2099_v24 }
 0x342   :  { %v975_v44 = vpop.f32.mrf.mxu1 }
 0x343   :  { %1427 = vst [vmem:[#allocation2 + $0x10] sm:$0xff] %v1359_v43   ;;  %v976_v49 = vadd.f32 %v2099_v24, %v975_v44 }
 0x344   :  { %v1687_v59 = vpop.f32.mrf.mxu1 }
 0x345   :  { %v987_v46 = vadd.f32 %v1687_v59, %v2099_v24 }
 0x346   :  { %v978_v48 = vpop.f32.mrf.mxu1 }
 0x347   :  { %v1374_v51 = vpack.c.bf16 %v987_v46, %v984_v45  ;;  %v979_v52 = vadd.f32 %v2099_v24, %v978_v48 }
 0x348   :  { %v1690_v53 = vpop.f32.mrf.mxu1 }
 0x349   :  { %1430 = vst [vmem:[#allocation2 + $0x28] sm:$0xff] %v1374_v51   ;;  %v1369_v54 = vpack.c.bf16 %v979_v52, %v976_v49  ;;  %v1000_v47 = vadd.f32 %v1690_v53, %v2099_v24 }
 0x34a   :  { %v991_v55 = vpop.f32.mrf.mxu1 }
 0x34b   :  { %1429 = vst [vmem:[#allocation2 + $0x20] sm:$0xff] %v1369_v54   ;;  %v992_v60 = vadd.f32 %v2099_v24, %v991_v55 }
 0x34c   :  { %v1691_v56 = vpop.f32.mrf.mxu1 }
 0x34d   :  { %v1003_v57 = vadd.f32 %v1691_v56, %v2099_v24 }
 0x34e   :  { %v994_v58 = vpop.f32.mrf.mxu1 }
 0x34f   :  { %v1384_v61 = vpack.c.bf16 %v1003_v57, %v1000_v47  ;;  %v995_v62 = vadd.f32 %v2099_v24, %v994_v58 }
 0x350   :  { %v1694_v63 = vpop.f32.mrf.mxu1 }
 0x351   :  { %1432 = vst [vmem:[#allocation2 + $0x38] sm:$0xff] %v1384_v61   ;;  %v1379_v0 = vpack.c.bf16 %v995_v62, %v992_v60  ;;  %v1016_v3 = vadd.f32 %v1694_v63, %v2099_v24 }
 0x352   :  { %v1007_v1 = vpop.f32.mrf.mxu1 }
 0x353   :  { %1431 = vst [vmem:[#allocation2 + $0x30] sm:$0xff] %v1379_v0   ;;  %v1008_v6 = vadd.f32 %v2099_v24, %v1007_v1 }
 0x354   :  { %v1695_v2 = vpop.f32.mrf.mxu1 }
 0x355   :  { %v1019_v4 = vadd.f32 %v1695_v2, %v2099_v24 }
 0x356   :  { %v1010_v5 = vpop.f32.mrf.mxu1 }
 0x357   :  { %v1394_v7 = vpack.c.bf16 %v1019_v4, %v1016_v3  ;;  %v1011_v8 = vadd.f32 %v2099_v24, %v1010_v5 }
 0x358   :  { %v1698_v9 = vpop.f32.mrf.mxu1 }
 0x359   :  { %1434 = vst [vmem:[#allocation2 + $0x48] sm:$0xff] %v1394_v7   ;;  %v1389_v10 = vpack.c.bf16 %v1011_v8, %v1008_v6  ;;  %v1032_v13 = vadd.f32 %v1698_v9, %v2099_v24 }
 0x35a   :  { %v1023_v11 = vpop.f32.mrf.mxu1 }
 0x35b   :  { %1433 = vst [vmem:[#allocation2 + $0x40] sm:$0xff] %v1389_v10   ;;  %v1024_v16 = vadd.f32 %v2099_v24, %v1023_v11 }
 0x35c   :  { %v1699_v12 = vpop.f32.mrf.mxu1 }
 0x35d   :  { %v1035_v14 = vadd.f32 %v1699_v12, %v2099_v24 }
 0x35e   :  { %v1026_v15 = vpop.f32.mrf.mxu1 }
 0x35f   :  { %v1404_v17 = vpack.c.bf16 %v1035_v14, %v1032_v13  ;;  %v1027_v18 = vadd.f32 %v2099_v24, %v1026_v15 }
 0x360   :  { %v1702_v19 = vpop.f32.mrf.mxu1 }
 0x361   :  { %1436 = vst [vmem:[#allocation2 + $0x58] sm:$0xff] %v1404_v17   ;;  %v1399_v20 = vpack.c.bf16 %v1027_v18, %v1024_v16  ;;  %v1048_v23 = vadd.f32 %v1702_v19, %v2099_v24 }
 0x362   :  { %v1039_v21 = vpop.f32.mrf.mxu1 }
 0x363   :  { %1435 = vst [vmem:[#allocation2 + $0x50] sm:$0xff] %v1399_v20   ;;  %v1040_v27 = vadd.f32 %v2099_v24, %v1039_v21 }
 0x364   :  { %v1703_v22 = vpop.f32.mrf.mxu1 }
 0x365   :  { %v1051_v25 = vadd.f32 %v1703_v22, %v2099_v24 }
 0x366   :  { %v1042_v26 = vpop.f32.mrf.mxu1 }
 0x367   :  { %v1414_v50 = vpack.c.bf16 %v1051_v25, %v1048_v23  ;;  %v1043_v28 = vadd.f32 %v2099_v24, %v1042_v26 }
 0x368   :  { %v1706_v29 = vpop.f32.mrf.mxu1 }
 0x369   :  { %1438 = vst [vmem:[#allocation2 + $0x68] sm:$0xff] %v1414_v50   ;;  %v1409_v30 = vpack.c.bf16 %v1043_v28, %v1040_v27  ;;  %v1064_v33 = vadd.f32 %v1706_v29, %v2099_v24 }
 0x36a   :  { %v1055_v31 = vpop.f32.mrf.mxu1 }
 0x36b   :  { %1437 = vst [vmem:[#allocation2 + $0x60] sm:$0xff] %v1409_v30   ;;  %v1056_v36 = vadd.f32 %v2099_v24, %v1055_v31 }
 0x36c   :  { %v1707_v32 = vpop.f32.mrf.mxu1 }
 0x36d   :  { %v1067_v34 = vadd.f32 %v1707_v32, %v2099_v24 }
 0x36e   :  { %v1058_v35 = vpop.f32.mrf.mxu1 }
 0x36f   :  { %v1424_v37 = vpack.c.bf16 %v1067_v34, %v1064_v33  ;;  %v1059_v38 = vadd.f32 %v2099_v24, %v1058_v35 }
 0x371   :  { %1440 = vst [vmem:[#allocation2 + $0x78] sm:$0xff] %v1424_v37   ;;  %v1419_v39 = vpack.c.bf16 %v1059_v38, %v1056_v36 }
 0x373   :  { %1439 = vst [vmem:[#allocation2 + $0x70] sm:$0xff] %v1419_v39  }
 0x374   :  { %1755 = shalt.err (!%p1752_p4)
}
 0x375   :  { %s1767_s29 = smov 64   ;;  %s1768_s30 = smov 4  }
 0x376   :  { %1241 = dma.vmem_to_hbm [thread:$0]  %s1236_s27, 2048, %s2143_s7, [#allocation3], %s1767_s29, %s1767_s29, %s1768_s30  }
 0x377   :  { %1764 = dma.done.wait [#allocation3], 2048  }
 0x378   :  { %1765 = vsyncadd [#allocation3], 4294965248 }
 0x379   :  { %1245 = vsyncpa [#allocation3], 1 }

</bundles_post_ra>
